<compile_context>
chip_gen: v5e
topology: v5e:2x2
jax: 0.10.0
libtpu: 0.0.40
codegen_flags: <defaults>
</compile_context>

<pallas_src>
import jax
import jax.numpy as jnp
from jax.experimental import pallas as pl
from jax.experimental.pallas import tpu as pltpu


def _silu(x):
    # sigmoid -> exp + reciprocal lower to the EUP slot; essentially free
    # next to the three MXU matmuls.
    return x * jax.nn.sigmoid(x)


def hourglass_fusion_kernel(x_ref, r_ref,
                            wm_ref, bm_ref,
                            wr_ref, br_ref,
                            wf_ref, bf_ref,
                            o_ref):
    """Fused: SiLU(x@Wm+bm) * SiLU(r@Wr+br) -> (.)@Wf+bf for one token tile."""
    x = x_ref[...]          # (TM, D) native dtype -> MXU fast path
    r = r_ref[...]

    # Down-projections, f32 accumulation on the MXU.
    h_main = jnp.dot(x, wm_ref[...], preferred_element_type=jnp.float32)
    h_main = _silu(h_main + bm_ref[...].astype(jnp.float32))

    h_res = jnp.dot(r, wr_ref[...], preferred_element_type=jnp.float32)
    h_res = _silu(h_res + br_ref[...].astype(jnp.float32))

    # Gate in f32, cast back to the storage dtype for the final MXU pass
    # (no-op for f32 inputs, bf16 fast path otherwise).
    fused = (h_main * h_res).astype(x_ref.dtype)

    out = jnp.dot(fused, wf_ref[...], preferred_element_type=jnp.float32)
    out = out + bf_ref[...].astype(jnp.float32)
    o_ref[...] = out.astype(o_ref.dtype)


def _pick_token_tile(M, D, H, dtype):
    """Largest sublane-aligned token tile fitting the VMEM budget.

    Budget accounts for: resident weights/biases (single-buffered),
    double-buffered x / residual / out tiles, and f32 intermediates
    (two (TM, H) activations + one (TM, D) accumulator).
    """
    itemsize = jnp.dtype(dtype).itemsize
    sublane = 16 if itemsize == 2 else 8
    m_up = max(sublane, ((M + sublane - 1) // sublane) * sublane)

    weight_bytes = (2 * D * H + H * D + 2 * H + D) * itemsize
    budget = 40 * 1024 * 1024  # headroom under the 48 MiB vmem_limit below

    best = sublane
    for tm in (1024, 512, 256, 128, 64, 32, 16, 8):
        if tm % sublane:
            continue
        act_bytes = 3 * 2 * tm * D * itemsize       # x, r, out double-buffered
        inter_bytes = tm * (3 * H + D) * 4          # f32 intermediates
        if weight_bytes + act_bytes + inter_bytes <= budget:
            best = tm
            break
    return min(best, m_up)


def hourglass_fusion(x, residual, params):
    """x, residual: (..., input_dim).  params: dict of weights/biases.

    Weights stored as (in, out); biases as (1, out) for lane layout.
    """
    wm, bm = params["w_main"], params["b_main"]
    wr, br = params["w_res"], params["b_res"]
    wf, bf = params["w_fuse"], params["b_fuse"]

    orig_shape = x.shape
    D = orig_shape[-1]
    H = wm.shape[1]

    x2 = x.reshape(-1, D)
    r2 = residual.reshape(-1, D)
    M = x2.shape[0]

    TM = _pick_token_tile(M, D, H, x.dtype)
    M_pad = pl.cdiv(M, TM) * TM
    if M_pad != M:
        pad = ((0, M_pad - M), (0, 0))
        x2 = jnp.pad(x2, pad)
        r2 = jnp.pad(r2, pad)

    grid = (M_pad // TM,)

    # Activation tiles march over the token axis; weights/biases are resident
    # (constant index_map -> fetched into VMEM once, reused every step).
    tok_spec = pl.BlockSpec((TM, D), lambda i: (i, 0))
    resident = lambda shp: pl.BlockSpec(shp, lambda i: (0, 0))

    itemsize = jnp.dtype(x.dtype).itemsize
    cost = pl.CostEstimate(
        flops=6 * M_pad * D * H,                      # three (M,D/H) matmuls
        transcendentals=2 * M_pad * H,                # exp in the two SiLUs
        bytes_accessed=(3 * M_pad * D + 3 * D * H + 2 * H + D) * itemsize,
    )

    out = pl.pallas_call(
        hourglass_fusion_kernel,
        out_shape=jax.ShapeDtypeStruct((M_pad, D), x.dtype),
        grid=grid,
        in_specs=[
            tok_spec,            # x tile
            tok_spec,            # residual tile
            resident((D, H)),    # w_main
            resident((1, H)),    # b_main
            resident((D, H)),    # w_res
            resident((1, H)),    # b_res
            resident((H, D)),    # w_fuse
            resident((1, D)),    # b_fuse
        ],
        out_specs=tok_spec,
        compiler_params=pltpu.CompilerParams(
            dimension_semantics=("parallel",),   # both TCs on v7x
            vmem_limit_bytes=48 * 1024 * 1024,   # above 16/32 MiB scoped default
        ),
        cost_estimate=cost,
    )(x2, r2, wm, bm, wr, br, wf, bf)

    if M_pad != M:
        out = out[:M]
    return out.reshape(orig_shape)


def init_params(key, input_dim, downscale_ratio, dtype=jnp.float32):
    """Deterministic synthetic init mirroring nn.Linear shapes.

    PyTorch nn.Linear(in, out) has weight (out, in); we store the transpose
    (in, out) so the kernel does x @ W directly.
    """
    hidden = input_dim // downscale_ratio
    ks = jax.random.split(key, 6)

    def lin(kw, kb, fan_in, fan_out):
        bound = 1.0 / jnp.sqrt(fan_in)
        w = jax.random.uniform(kw, (fan_in, fan_out), dtype, -bound, bound)
        b = jax.random.uniform(kb, (1, fan_out), dtype, -bound, bound)
        return w, b

    w_main, b_main = lin(ks[0], ks[1], input_dim, hidden)
    w_res, b_res = lin(ks[2], ks[3], input_dim, hidden)
    w_fuse, b_fuse = lin(ks[4], ks[5], hidden, input_dim)
    return dict(w_main=w_main, b_main=b_main,
                w_res=w_res, b_res=b_res,
                w_fuse=w_fuse, b_fuse=b_fuse)


def reference(x, residual, params):
    h1 = jax.nn.silu(x @ params["w_main"] + params["b_main"][0])
    h2 = jax.nn.silu(residual @ params["w_res"] + params["b_res"][0])
    return (h1 * h2) @ params["w_fuse"] + params["b_fuse"][0]


if __name__ == "__main__":
    batch, seq, input_dim, downscale_ratio = 2, 8, 32, 4

    key = jax.random.PRNGKey(0)
    kx, kr, kp = jax.random.split(key, 3)
    x = jax.random.normal(kx, (batch, seq, input_dim), jnp.float32)
    residual = jax.random.normal(kr, (batch, seq, input_dim), jnp.float32)
    params = init_params(kp, input_dim, downscale_ratio)

    out = hourglass_fusion(x, residual, params)
    out = jax.block_until_ready(out)

    ref = reference(x, residual, params)
    assert out.shape == (batch, seq, input_dim)
    assert jnp.allclose(out, ref, atol=1e-5, rtol=1e-5), "mismatch vs reference"

    print("KERNEL_OK")
</pallas_src>

<mosaic_0001>
module attributes {stable_mosaic.version = 11 : i64} {
  func.func @hourglass_fusion_kernel(%arg0: i32, %arg1: memref<16x32xf32, #tpu.memory_space<vmem>>, %arg2: memref<16x32xf32, #tpu.memory_space<vmem>>, %arg3: memref<32x8xf32, #tpu.memory_space<vmem>>, %arg4: memref<1x8xf32, #tpu.memory_space<vmem>>, %arg5: memref<32x8xf32, #tpu.memory_space<vmem>>, %arg6: memref<1x8xf32, #tpu.memory_space<vmem>>, %arg7: memref<8x32xf32, #tpu.memory_space<vmem>>, %arg8: memref<1x32xf32, #tpu.memory_space<vmem>>, %arg9: memref<16x32xf32, #tpu.memory_space<vmem>>) attributes {dimension_semantics = [#tpu.dimension_semantics<parallel>], iteration_bounds = array<i64: 1>, scalar_prefetch = 0 : i64, scratch_operands = 0 : i64, tpu.core_type = #tpu.core_type<tc>, window_params = [{transform_indices = @transform_0, window_bounds = array<i64: 16, 32>}, {transform_indices = @transform_1, window_bounds = array<i64: 16, 32>}, {pipeline_mode = #tpu.pipeline_mode<synchronous>, transform_indices = @transform_2, window_bounds = array<i64: 32, 8>}, {pipeline_mode = #tpu.pipeline_mode<synchronous>, transform_indices = @transform_3, window_bounds = array<i64: 1, 8>}, {pipeline_mode = #tpu.pipeline_mode<synchronous>, transform_indices = @transform_4, window_bounds = array<i64: 32, 8>}, {pipeline_mode = #tpu.pipeline_mode<synchronous>, transform_indices = @transform_5, window_bounds = array<i64: 1, 8>}, {pipeline_mode = #tpu.pipeline_mode<synchronous>, transform_indices = @transform_6, window_bounds = array<i64: 8, 32>}, {pipeline_mode = #tpu.pipeline_mode<synchronous>, transform_indices = @transform_7, window_bounds = array<i64: 1, 32>}, {transform_indices = @transform_8, window_bounds = array<i64: 16, 32>}]} {
    %c0 = arith.constant 0 : index
    %c0_0 = arith.constant 0 : index
    %0 = vector.load %arg1[%c0, %c0_0] : memref<16x32xf32, #tpu.memory_space<vmem>>, vector<16x32xf32>
    %c0_1 = arith.constant 0 : index
    %c0_2 = arith.constant 0 : index
    %1 = vector.load %arg2[%c0_1, %c0_2] : memref<16x32xf32, #tpu.memory_space<vmem>>, vector<16x32xf32>
    %c0_3 = arith.constant 0 : index
    %c0_4 = arith.constant 0 : index
    %2 = vector.load %arg3[%c0_3, %c0_4] : memref<32x8xf32, #tpu.memory_space<vmem>>, vector<32x8xf32>
    %cst = arith.constant dense<0.000000e+00> : vector<16x8xf32>
    %3 = tpu.matmul %0, %2, %cst {dimension_numbers = #tpu.dot_dimension_numbers<[1], [0], [0], [1], [0, 0, 1, 1], [], []>} : vector<16x32xf32>, vector<32x8xf32>, vector<16x8xf32> -> vector<16x8xf32>
    %c0_5 = arith.constant 0 : index
    %c0_6 = arith.constant 0 : index
    %4 = vector.load %arg4[%c0_5, %c0_6] : memref<1x8xf32, #tpu.memory_space<vmem>>, vector<1x8xf32>
    %5 = vector.broadcast %4 : vector<1x8xf32> to vector<16x8xf32>
    %6 = arith.addf %3, %5 : vector<16x8xf32>
    %7 = arith.negf %6 : vector<16x8xf32>
    %8 = math.exp %7 : vector<16x8xf32>
    %cst_7 = arith.constant 1.000000e+00 : f32
    %9 = vector.broadcast %cst_7 : f32 to vector<16x8xf32>
    %10 = arith.addf %9, %8 : vector<16x8xf32>
    %11 = arith.divf %9, %10 : vector<16x8xf32>
    %12 = arith.mulf %6, %11 : vector<16x8xf32>
    %c0_8 = arith.constant 0 : index
    %c0_9 = arith.constant 0 : index
    %13 = vector.load %arg5[%c0_8, %c0_9] : memref<32x8xf32, #tpu.memory_space<vmem>>, vector<32x8xf32>
    %cst_10 = arith.constant dense<0.000000e+00> : vector<16x8xf32>
    %14 = tpu.matmul %1, %13, %cst_10 {dimension_numbers = #tpu.dot_dimension_numbers<[1], [0], [0], [1], [0, 0, 1, 1], [], []>} : vector<16x32xf32>, vector<32x8xf32>, vector<16x8xf32> -> vector<16x8xf32>
    %c0_11 = arith.constant 0 : index
    %c0_12 = arith.constant 0 : index
    %15 = vector.load %arg6[%c0_11, %c0_12] : memref<1x8xf32, #tpu.memory_space<vmem>>, vector<1x8xf32>
    %16 = vector.broadcast %15 : vector<1x8xf32> to vector<16x8xf32>
    %17 = arith.addf %14, %16 : vector<16x8xf32>
    %18 = arith.negf %17 : vector<16x8xf32>
    %19 = math.exp %18 : vector<16x8xf32>
    %cst_13 = arith.constant 1.000000e+00 : f32
    %20 = vector.broadcast %cst_13 : f32 to vector<16x8xf32>
    %21 = arith.addf %20, %19 : vector<16x8xf32>
    %22 = arith.divf %20, %21 : vector<16x8xf32>
    %23 = arith.mulf %17, %22 : vector<16x8xf32>
    %24 = arith.mulf %12, %23 : vector<16x8xf32>
    %c0_14 = arith.constant 0 : index
    %c0_15 = arith.constant 0 : index
    %25 = vector.load %arg7[%c0_14, %c0_15] : memref<8x32xf32, #tpu.memory_space<vmem>>, vector<8x32xf32>
    %cst_16 = arith.constant dense<0.000000e+00> : vector<16x32xf32>
    %26 = tpu.matmul %24, %25, %cst_16 {dimension_numbers = #tpu.dot_dimension_numbers<[1], [0], [0], [1], [0, 0, 1, 1], [], []>} : vector<16x8xf32>, vector<8x32xf32>, vector<16x32xf32> -> vector<16x32xf32>
    %c0_17 = arith.constant 0 : index
    %c0_18 = arith.constant 0 : index
    %27 = vector.load %arg8[%c0_17, %c0_18] : memref<1x32xf32, #tpu.memory_space<vmem>>, vector<1x32xf32>
    %28 = vector.broadcast %27 : vector<1x32xf32> to vector<16x32xf32>
    %29 = arith.addf %26, %28 : vector<16x32xf32>
    %c0_19 = arith.constant 0 : index
    %c0_20 = arith.constant 0 : index
    %30 = vector.load %arg9[%c0_19, %c0_20] : memref<16x32xf32, #tpu.memory_space<vmem>>, vector<16x32xf32>
    tpu.vector_store %arg9[%c0_19, %c0_20], %29 {strides = array<i32>} : memref<16x32xf32, #tpu.memory_space<vmem>>, vector<16x32xf32>,
    return
  }
  func.func @transform_0(%arg0: i32) -> (i32, i32) {
    %c0_i32 = arith.constant 0 : i32
    %c0_i32_0 = arith.constant 0 : i32
    return %arg0, %c0_i32 : i32, i32
  }
  func.func @transform_1(%arg0: i32) -> (i32, i32) {
    %c0_i32 = arith.constant 0 : i32
    %c0_i32_0 = arith.constant 0 : i32
    return %arg0, %c0_i32 : i32, i32
  }
  func.func @transform_2(%arg0: i32) -> (i32, i32) {
    %c0_i32 = arith.constant 0 : i32
    %c0_i32_0 = arith.constant 0 : i32
    %c0_i32_1 = arith.constant 0 : i32
    return %c0_i32, %c0_i32_0 : i32, i32
  }
  func.func @transform_3(%arg0: i32) -> (i32, i32) {
    %c0_i32 = arith.constant 0 : i32
    %c0_i32_0 = arith.constant 0 : i32
    %c0_i32_1 = arith.constant 0 : i32
    return %c0_i32, %c0_i32_0 : i32, i32
  }
  func.func @transform_4(%arg0: i32) -> (i32, i32) {
    %c0_i32 = arith.constant 0 : i32
    %c0_i32_0 = arith.constant 0 : i32
    %c0_i32_1 = arith.constant 0 : i32
    return %c0_i32, %c0_i32_0 : i32, i32
  }
  func.func @transform_5(%arg0: i32) -> (i32, i32) {
    %c0_i32 = arith.constant 0 : i32
    %c0_i32_0 = arith.constant 0 : i32
    %c0_i32_1 = arith.constant 0 : i32
    return %c0_i32, %c0_i32_0 : i32, i32
  }
  func.func @transform_6(%arg0: i32) -> (i32, i32) {
    %c0_i32 = arith.constant 0 : i32
    %c0_i32_0 = arith.constant 0 : i32
    %c0_i32_1 = arith.constant 0 : i32
    return %c0_i32, %c0_i32_0 : i32, i32
  }
  func.func @transform_7(%arg0: i32) -> (i32, i32) {
    %c0_i32 = arith.constant 0 : i32
    %c0_i32_0 = arith.constant 0 : i32
    %c0_i32_1 = arith.constant 0 : i32
    return %c0_i32, %c0_i32_0 : i32, i32
  }
  func.func @transform_8(%arg0: i32) -> (i32, i32) {
    %c0_i32 = arith.constant 0 : i32
    %c0_i32_0 = arith.constant 0 : i32
    return %arg0, %c0_i32 : i32, i32
  }
}

</mosaic_0001>

<bundles_post_ra>
// kernel: tpu_custom_call.1
= control target key start
LH: loop header
LB: loop body
LE: loop exit
PB: predicated region body
PF: predicated region fallthrough
CT: control target
= control target key end

     0   :  { %vm42_vm0 = vcmask 261120   ;;  %s423_s0 = inlined_call_operand.vmem [shape: f32[16,32], index: 0, kind: input, shape index: {}]   ;;  %s424_s1 = inlined_call_operand.vmem [shape: f32[16,32], index: 1, kind: input, shape index: {}]   ;;  %s425_s2 = inlined_call_operand.vmem [shape: f32[32,8], index: 2, kind: input, shape index: {}]   ;;  %s426_s3 = inlined_call_operand.vmem [shape: f32[1,8], index: 3, kind: input, shape index: {}]   ;;  %s427_s4 = inlined_call_operand.vmem [shape: f32[32,8], index: 4, kind: input, shape index: {}]   ;;  %s428_s5 = inlined_call_operand.vmem [shape: f32[1,8], index: 5, kind: input, shape index: {}]   ;;  %s429_s6 = inlined_call_operand.vmem [shape: f32[8,32], index: 6, kind: input, shape index: {}]   ;;  %s430_s7 = inlined_call_operand.vmem [shape: f32[1,32], index: 7, kind: input, shape index: {}]   ;;  %s431_s8 = inlined_call_operand.hbm [shape: f32[16,32], index: 8, kind: output, shape index: {}]  }
   0x1   :  { %v37_v0 = vld [vmem:[%s425_s2 + $0x18] sm:$0xff]  ;;  %v36_v2 = vld [vmem:[%s425_s2 + $0x10] sm:$0xff]  ;;  %v35_v4 = vld [vmem:[%s425_s2 + $0x8] sm:$0xff] }
   0x2   :  { %v115_v1 = vld [vmem:[%s427_s4 + $0x18] sm:$0xff]  ;;  %61 = vmatpush.msra.mxu0 %v37_v0  ;;  %256 = vmatpush.msra.mxu3 %v37_v0  ;;  %v114_v3 = vld [vmem:[%s427_s4 + $0x10] sm:$0xff]  ;;  %v113_v5 = vld [vmem:[%s427_s4 + $0x8] sm:$0xff] }
   0x3   :  { %138 = vmatpush.msra.mxu1 %v115_v1  ;;  %v34_v6 = vld [vmem:[%s425_s2] sm:$0xff] }
   0x4   :  { %62 = vmatpush.msra.mxu0 %v36_v2  ;;  %257 = vmatpush.msra.mxu3 %v36_v2  ;;  %v112_v7 = vld [vmem:[%s427_s4] sm:$0xff] }
   0x5   :  { %139 = vmatpush.msra.mxu1 %v114_v3  ;;  %v30_v8 = vld [vmem:[%s423_s0] sm:$0xff] }
   0x6   :  { %63 = vmatpush.msra.mxu0 %v35_v4  ;;  %258 = vmatpush.msra.mxu3 %v35_v4 }
   0x7   :  { %13 = vsyncpa [#allocation3], 0  ;;  %140 = vmatpush.msra.mxu1 %v113_v5  ;;  %v31_v9 = vld [vmem:[%s423_s0 + $0x8] sm:$0xff]  ;;  %v32_v10 = vld [vmem:[%s424_s1] sm:$0xff]  ;;  %vm196_vm11 = vcmask 64512   ;;  %s234_s12 = sshll.u32 %s431_s8, 4  ;;  %s235_s12 = int_to_ptr.hbm [resolvable:$true] %s234_s12 }
   0x8   :  { %64 = vmatpush.msra.mxu0 %v34_v6  ;;  %259 = vmatpush.msra.mxu3 %v34_v6  ;;  %v33_v11 = vld [vmem:[%s424_s1 + $0x8] sm:$0xff]  ;;  %v263_v12 = vld [vmem:[%s426_s3] ss:$0 sm:$0xff]  ;;  %s309_s13 = smov 128   ;;  %s310_s14 = smov 8  }
   0x9   :  { %141 = vmatpush.msra.mxu1 %v112_v7  ;;  %246 = vmatmul.msk.f32.vlgmr.msra.gmra.mxu0 %vm42_vm0, %v30_v8  ;;  %v264_v13 = vld [vmem:[%s428_s5] ss:$0 sm:$0xff]  ;;  %s308_s5 = smov [#allocation2]  }
   0xa   :  { %247 = vmatmul.msk.f32.vlgmr.msra.gmra.mxu3 %vm42_vm0, %v31_v9  ;;  %250 = vmatmul.msk.f32.vlgmr.msra.gmra.mxu1 %vm42_vm0, %v32_v10  ;;  %v191_v20 = vld [vmem:[%s429_s6] sm:$0xff]  ;;  %s232_s6 = sshll.u32 %s308_s5, 4  ;;  %s233_s6 = int_to_ptr.vmem [resolvable:$true] %s232_s6 }
   0xb   :  { %218 = vmatpush.msra.mxu2 %v191_v20 }
  0x12   :  { %251 = vmatmul.msk.f32.gmra.mxu1 %vm42_vm0, %v33_v11 }
  0x86   :  { %v66_v14 = vpop.f32.mrf.mxu0 }
  0x87   :  { %v67_v15 = vadd.f32 %v263_v12, %v66_v14  ;;  %v143_v16 = vpop.f32.mrf.mxu1 }
  0x88   :  { %v144_v17 = vadd.f32 %v264_v13, %v143_v16 }
  0x89   :  { %v248_v18 = vmul.f32 -1.442695, %v67_v15 }
  0x8a   :  { %v252_v19 = vmul.f32 -1.442695, %v144_v17 }
  0x8b   :  { %266 = vpow2.f32 %v248_v18 }
  0x8c   :  { %268 = vpow2.f32 %v252_v19 }
  0x8d   :  { %v69_v21 = vpop.f32.mrf.mxu3 }
  0x8e   :  { %v405_v22 = vadd.f32 %v263_v12, %v69_v21 }
  0x8f   :  { %v146_v23 = vpop.f32.mrf.mxu1 }
  0x90   :  { %v249_v24 = vmul.f32 -1.442695, %v405_v22  ;;  %v408_v25 = vadd.f32 %v264_v13, %v146_v23 }
  0x91   :  { %v267_v26 = vpop.eup %266 }
  0x92   :  { %v269_v27 = vpop.eup %268  ;;  %v78_v28 = vadd.f32 1.0, %v267_v26  ;;  %270 = vpow2.f32 %v249_v24  ;;  %v253_v29 = vmul.f32 -1.442695, %v408_v25 }
  0x93   :  { %v155_v30 = vadd.f32 1.0, %v269_v27 }
  0x94   :  { %272 = vrcp.f32 %v78_v28  ;;  %v89_v40 = vand.u32 2147483647, %v78_v28  ;;  %v91_v41 = vand.u32 2147483648, %v78_v28  ;;  %vm85_vm3 = vweird.f32 %v78_v28 }
  0x95   :  { %274 = vrcp.f32 %v155_v30  ;;  %v168_v44 = vand.u32 2147483648, %v155_v30  ;;  %v166_v46 = vand.u32 2147483647, %v155_v30  ;;  %vm162_vm5 = vweird.f32 %v155_v30 }
  0x96   :  { %276 = vpow2.f32 %v253_v29  ;;  %v92_v49 = vor.u32 1.1754944e-38, %v91_v41  ;;  %vm90_vm6 = vcmp.eq.f32.partialorder %v89_v40, 8.507059e+37 }
  0x97   :  { %v169_v53 = vor.u32 1.1754944e-38, %v168_v44  ;;  %vm167_vm8 = vcmp.eq.f32.partialorder %v166_v46, 8.507059e+37 }
  0x98   :  { %v271_v31 = vpop.eup %270 }
  0x99   :  { %v79_v32 = vadd.f32 1.0, %v271_v31 }
  0x9a   :  { %v273_v33 = vpop.eup %272 }
  0x9b   :  { %v275_v34 = vpop.eup %274  ;;  %v81_v35 = vmul.f32 %v273_v33, %v78_v28  ;;  %278 = vrcp.f32 %v79_v32  ;;  %vm86_vm1 = vweird.f32 %v273_v33  ;;  %vm100_vm10 = vweird.f32 %v79_v32 }
  0x9c   :  { %v277_v36 = vpop.eup %276  ;;  %v158_v37 = vmul.f32 %v275_v34, %v155_v30  ;;  %vm163_vm2 = vweird.f32 %v275_v34  ;;  %vm87_vm4 = vmor %vm85_vm3, %vm86_vm1  ;;  %v106_v63 = vand.u32 2147483648, %v79_v32  ;;  %v104_v1 = vand.u32 2147483647, %v79_v32 }
  0x9d   :  { %v82_v38 = vsub.f32 1.0, %v81_v35  ;;  %v156_v39 = vadd.f32 1.0, %v277_v36  ;;  %vm164_vm7 = vmor %vm162_vm5, %vm163_vm2 }
  0x9e   :  { %v159_v42 = vsub.f32 1.0, %v158_v37  ;;  %v107_v8 = vor.u32 1.1754944e-38, %v106_v63  ;;  %vm105_vm14 = vcmp.eq.f32.partialorder %v104_v1, 8.507059e+37 }
  0x9f   :  { %v83_v43 = vmul.f32 %v273_v33, %v82_v38  ;;  %280 = vrcp.f32 %v156_v39  ;;  %v183_v4 = vand.u32 2147483648, %v156_v39  ;;  %v181_v7 = vand.u32 2147483647, %v156_v39 }
  0xa0   :  { %v160_v45 = vmul.f32 %v275_v34, %v159_v42  ;;  %vm177_vm15 = vweird.f32 %v156_v39 }
  0xa1   :  { %v279_v47 = vpop.eup %278  ;;  %v84_v48 = vadd.f32 %v273_v33, %v83_v43  ;;  %v184_v11 = vor.u32 1.1754944e-38, %v183_v4  ;;  %vm182_vm2 = vcmp.eq.f32.partialorder %v181_v7, 8.507059e+37 }
  0xa2   :  { %v161_v50 = vadd.f32 %v275_v34, %v160_v45  ;;  %v96_v51 = vmul.f32 %v279_v47, %v79_v32  ;;  %vm101_vm9 = vweird.f32 %v279_v47 }
  0xa3   :  { %v88_v52 = vsel %vm87_vm4, %v273_v33, %v84_v48  ;;  %vm102_vm12 = vmor %vm100_vm10, %vm101_vm9 }
  0xa4   :  { %v93_v54 = vsel %vm90_vm6, %v92_v49, %v88_v52  ;;  %v165_v55 = vsel %vm164_vm7, %v275_v34, %v161_v50  ;;  %v97_v56 = vsub.f32 1.0, %v96_v51 }
  0xa5   :  { %v281_v57 = vpop.eup %280  ;;  %v110_v58 = vmul.f32 %v93_v54, %v67_v15  ;;  %v170_v59 = vsel %vm167_vm8, %v169_v53, %v165_v55 }
  0xa6   :  { %v187_v60 = vmul.f32 %v170_v59, %v144_v17  ;;  %v98_v61 = vmul.f32 %v279_v47, %v97_v56  ;;  %v173_v62 = vmul.f32 %v281_v57, %v156_v39  ;;  %vm178_vm13 = vweird.f32 %v281_v57  ;;  %v265_v17 = vld [vmem:[%s430_s7] ss:$0 sm:$0xff] }
  0xa7   :  { %vm179_vm1 = vmor %vm177_vm15, %vm178_vm13 }
  0xa8   :  { %v99_v0 = vadd.f32 %v279_v47, %v98_v61  ;;  %v174_v2 = vsub.f32 1.0, %v173_v62  ;;  %v189_v3 = vmul.f32 %v187_v60, %v110_v58 }
  0xaa   :  { %v103_v5 = vsel %vm102_vm12, %v279_v47, %v99_v0  ;;  %v175_v6 = vmul.f32 %v281_v57, %v174_v2  ;;  %254 = vmatmul.msk.f32.vlgmr.msra.gmra.mxu2 %vm196_vm11, %v189_v3 }
  0xab   :  { %v108_v10 = vsel %vm105_vm14, %v107_v8, %v103_v5 }
  0xac   :  { %v176_v9 = vadd.f32 %v281_v57, %v175_v6  ;;  %v111_v14 = vmul.f32 %v108_v10, %v405_v22 }
  0xae   :  { %v180_v12 = vsel %vm179_vm1, %v281_v57, %v176_v9 }
  0xaf   :  { %v185_v13 = vsel %vm182_vm2, %v184_v11, %v180_v12 }
  0xb0   :  { %v188_v15 = vmul.f32 %v185_v13, %v408_v25 }
  0xb2   :  { %v190_v16 = vmul.f32 %v188_v15, %v111_v14 }
  0xb4   :  { %255 = vmatmul.msk.f32.gmra.mxu2 %vm196_vm11, %v190_v16 }
 0x12d   :  { %v220_v18 = vpop.f32.mrf.mxu2 }
 0x12e   :  { %v221_v19 = vadd.f32 %v265_v17, %v220_v18 }
 0x130   :  { %226 = vst.msk [vmem:[#allocation2] sm:$0xff] %vm42_vm0, %v221_v19 }
 0x137   :  { %v223_v20 = vpop.f32.mrf.mxu2 }
 0x138   :  { %v224_v21 = vadd.f32 %v265_v17, %v223_v20 }
 0x13a   :  { %227 = vst.msk [vmem:[#allocation2 + $0x8] sm:$0xff] %vm42_vm0, %v224_v21 }
 0x13b   :  { %240 = dma.vmem_to_hbm [thread:$0]  %s233_s6, 256, %s235_s12, [#allocation3], %s309_s13, %s309_s13, %s310_s14  }
 0x13c   :  { %306 = dma.done.wait [#allocation3], 256  }
 0x13d   :  { %307 = vsyncadd [#allocation3], 4294967040 }
 0x13e   :  { %245 = vsyncpa [#allocation3], 1 }

</bundles_post_ra>
